<compile_context>
chip_gen: v7x
topology: tpu7x:2x2x1
jax: 0.10.0
libtpu: 0.0.40
codegen_flags: <defaults>
</compile_context>

<pallas_src>
import functools

import jax
import jax.numpy as jnp
from jax.experimental import pallas as pl
from jax.experimental.pallas import tpu as pltpu


def _round_up(a, b):
    return (a + b - 1) // b * b


# ---------------------------------------------------------------------------
# Kernel: (TM, TK) x-tile  @  (TK, N_pad) stripe of the (pre-transposed) weight,
# accumulated in f32 across the K grid axis (resident output block / scratch).
# ---------------------------------------------------------------------------
def _proj_kernel(x_ref, w_ref, o_ref, *scratch, tk, w_resident, mxu_bf16, single_k):
    acc_ref = scratch[0] if scratch else o_ref
    k = pl.program_id(1)

    if w_resident:
        # Full W lives in VMEM (constant index_map); take the current K stripe.
        off = pl.multiple_of(k * tk, 128)
        w = w_ref[pl.ds(off, tk), :]
    else:
        w = w_ref[...]
    x = x_ref[...]

    if mxu_bf16:
        # bf16 feed to the MXU, f32 accumulation (JL projection is noise tolerant).
        x = x.astype(jnp.bfloat16)
        w = w.astype(jnp.bfloat16)

    part = jnp.dot(x, w, preferred_element_type=jnp.float32)

    if single_k:
        acc_ref[...] = part
    else:
        @pl.when(k == 0)
        def _():
            acc_ref[...] = jnp.zeros_like(acc_ref)

        acc_ref[...] += part

    if scratch:
        @pl.when(k == pl.num_programs(1) - 1)
        def _():
            o_ref[...] = acc_ref[...].astype(o_ref.dtype)


@functools.partial(jax.jit, static_argnames=("tm_max", "tk_max", "mxu_bf16"))
def jl_random_projection(x, W, *, tm_max=512, tk_max=2048, mxu_bf16=True):
    """y = x @ W^T  (nn.Linear, bias=False).  W has shape (out_dim, in_dim)."""
    *lead, in_dim = x.shape
    out_dim, w_in = W.shape
    assert w_in == in_dim, "W must be (out_dim, in_dim)"
    x2 = x.reshape(-1, in_dim)
    M = x2.shape[0]

    # --- static tile sizing --------------------------------------------------
    tk_max = max(128, (tk_max // 128) * 128)
    N_pad = _round_up(out_dim, 128)                  # lane-dense output stores
    K_pad = _round_up(in_dim, 128)
    if K_pad <= tk_max:
        TK = K_pad                                   # single K stripe
    else:
        TK = tk_max
        K_pad = _round_up(K_pad, TK)                 # keep K grid exact (zero pad)

    # >=2 M tiles whenever possible so v7x's two TensorCores both get work.
    TM = max(8, min(tm_max, _round_up(-(-M // 2), 8)))

    # --- generation-aware VMEM budget ----------------------------------------
    try:
        vmem_cap = int(pltpu.get_tpu_info().vmem_capacity_bytes)
    except Exception:
        vmem_cap = 64 * 1024 * 1024                  # conservative (v7x)
    vmem_limit = min((vmem_cap * 3) // 4, 96 * 1024 * 1024)
    budget = vmem_limit - 2 * 1024 * 1024            # headroom

    out_dtype = jnp.dtype(x.dtype)
    use_scratch = out_dtype != jnp.dtype(jnp.float32)
    w_store_dtype = (jnp.dtype(jnp.bfloat16)
                     if (mxu_bf16 and jnp.dtype(W.dtype).itemsize > 2)
                     else jnp.dtype(W.dtype))
    x_item = jnp.dtype(x.dtype).itemsize
    w_item = w_store_dtype.itemsize
    o_item = out_dtype.itemsize

    def vmem_need(tm, tk, resident):
        x_buf = 2 * tm * tk * x_item                           # double-buffered x
        w_buf = 2 * (K_pad if resident else tk) * N_pad * w_item
        o_buf = 2 * tm * N_pad * o_item
        acc = tm * N_pad * 4 if use_scratch else 0
        return x_buf + w_buf + o_buf + acc

    w_resident = vmem_need(TM, TK, True) <= budget
    while vmem_need(TM, TK, w_resident) > budget and TM > 8:
        TM = max(8, _round_up(TM // 2, 8))
    # TODO(synk): very large out_dim would additionally need an N grid axis.

    grid = (pl.cdiv(M, TM), K_pad // TK)
    single_k = grid[1] == 1

    # --- K-tail padding only (no M pad, no HBM round trip of x otherwise) ----
    if x2.shape[1] != K_pad:
        x2 = jnp.pad(x2, ((0, 0), (0, K_pad - in_dim)))
    Wp = W
    if (out_dim, in_dim) != (N_pad, K_pad):
        Wp = jnp.pad(W, ((0, N_pad - out_dim), (0, K_pad - in_dim)))
    Wt = Wp.astype(w_store_dtype).T                  # (K_pad, N_pad), one-time

    # --- specs ----------------------------------------------------------------
    x_spec = pl.BlockSpec((TM, TK), lambda i, k: (i, k))
    if w_resident:
        w_spec = pl.BlockSpec((K_pad, N_pad), lambda i, k: (0, 0))  # fetched once
    else:
        w_spec = pl.BlockSpec((TK, N_pad), lambda i, k: (k, 0))     # streamed
    out_spec = pl.BlockSpec((TM, N_pad), lambda i, k: (i, 0))
    scratch_shapes = [pltpu.VMEM((TM, N_pad), jnp.float32)] if use_scratch else []

    w_reads = 1 if w_resident else grid[0]
    cost = pl.CostEstimate(
        flops=2 * M * K_pad * N_pad,
        transcendentals=0,
        bytes_accessed=(M * K_pad * x_item
                        + w_reads * K_pad * N_pad * w_item
                        + M * N_pad * o_item),
    )

    kernel = functools.partial(_proj_kernel, tk=TK, w_resident=w_resident,
                               mxu_bf16=mxu_bf16, single_k=single_k)

    y2 = pl.pallas_call(
        kernel,
        out_shape=jax.ShapeDtypeStruct((M, N_pad), out_dtype),
        grid_spec=pltpu.PrefetchScalarGridSpec(
            num_scalar_prefetch=0,
            grid=grid,
            in_specs=[x_spec, w_spec],
            out_specs=out_spec,
            scratch_shapes=scratch_shapes,
        ),
        compiler_params=pltpu.CompilerParams(
            dimension_semantics=("parallel", "arbitrary"),
            vmem_limit_bytes=vmem_limit,
        ),
        cost_estimate=cost,
    )(x2, Wt)

    return y2[:, :out_dim].reshape(*lead, out_dim)


# ---------------------------------------------------------------------------
# Deterministic parameter init mirroring JLRandomProjection(method='sparse'):
# each output row has s=3 nonzero entries at random positions, values +-1/sqrt(3).
# ---------------------------------------------------------------------------
def make_sparse_jl_weight(key, in_dim, out_dim, s=3, dtype=jnp.float32):
    rows = []
    for i in range(out_dim):
        k_perm, k_sign = jax.random.split(jax.random.fold_in(key, i))
        idx = jax.random.permutation(k_perm, in_dim)[:s]
        signs = jax.random.randint(k_sign, (s,), 0, 2).astype(dtype) * 2.0 - 1.0
        row = jnp.zeros((in_dim,), dtype=dtype).at[idx].set(signs / (s ** 0.5))
        rows.append(row)
    return jnp.stack(rows, axis=0)  # (out_dim, in_dim)


if __name__ == "__main__":
    key = jax.random.PRNGKey(0)
    k_x, k_w = jax.random.split(key)

    batch, seq, in_dim, out_dim = 2, 8, 32, 16
    x = jax.random.normal(k_x, (batch, seq, in_dim), dtype=jnp.float32)
    W = make_sparse_jl_weight(k_w, in_dim, out_dim)  # (out_dim, in_dim)

    y = jl_random_projection(x, W)
    jax.block_until_ready(y)
    assert y.shape == (batch, seq, out_dim)

    # Reference with the same bf16-in / f32-accumulate arithmetic as the kernel.
    xb = x.astype(jnp.bfloat16).astype(jnp.float32)
    wb = W.astype(jnp.bfloat16).astype(jnp.float32)
    y_ref_bf16 = jnp.einsum("bsi,oi->bso", xb, wb)
    assert jnp.allclose(y, y_ref_bf16, atol=1e-4, rtol=1e-4), "mismatch vs bf16 ref"

    # Loose check against the pure-f32 reference (bf16 MXU feed is intentional).
    y_ref_f32 = jnp.einsum("bsi,oi->bso", x, W)
    assert jnp.allclose(y, y_ref_f32, atol=3e-2, rtol=3e-2), "mismatch vs f32 ref"

    print("KERNEL_OK")
</pallas_src>

<mosaic_0001>
module attributes {stable_mosaic.version = 11 : i64} {
  func.func @_proj_kernel(%arg0: i32, %arg1: i32, %arg2: memref<8x128xf32, #tpu.memory_space<vmem>>, %arg3: memref<128x128xbf16, #tpu.memory_space<vmem>>, %arg4: memref<8x128xf32, #tpu.memory_space<vmem>>) attributes {dimension_semantics = [#tpu.dimension_semantics<parallel>, #tpu.dimension_semantics<arbitrary>], iteration_bounds = array<i64: 2, 1>, scalar_prefetch = 0 : i64, scratch_operands = 0 : i64, tpu.core_type = #tpu.core_type<tc>, window_params = [{transform_indices = @transform_0, window_bounds = array<i64: 8, 128>}, {pipeline_mode = #tpu.pipeline_mode<synchronous>, transform_indices = @transform_1, window_bounds = array<i64: 128, 128>}, {transform_indices = @transform_2, window_bounds = array<i64: 8, 128>}]} {
    %c128_i32 = arith.constant 128 : i32
    %0 = arith.muli %arg1, %c128_i32 : i32
    %1 = tpu.assume_multiple %0, 128 : i32
    %2 = arith.index_cast %1 : i32 to index
    %c0 = arith.constant 0 : index
    %3 = vector.load %arg3[%2, %c0] : memref<128x128xbf16, #tpu.memory_space<vmem>>, vector<128x128xbf16>
    %c0_0 = arith.constant 0 : index
    %c0_1 = arith.constant 0 : index
    %4 = vector.load %arg2[%c0_0, %c0_1] : memref<8x128xf32, #tpu.memory_space<vmem>>, vector<8x128xf32>
    %5 = arith.truncf %4 : vector<8x128xf32> to vector<8x128xbf16>
    %cst = arith.constant dense<0.000000e+00> : vector<8x128xf32>
    %6 = tpu.matmul %5, %3, %cst {dimension_numbers = #tpu.dot_dimension_numbers<[1], [0], [0], [1], [0, 0, 1, 1], [], []>} : vector<8x128xbf16>, vector<128x128xbf16>, vector<8x128xf32> -> vector<8x128xf32>
    %c0_2 = arith.constant 0 : index
    %c0_3 = arith.constant 0 : index
    %7 = vector.load %arg4[%c0_2, %c0_3] : memref<8x128xf32, #tpu.memory_space<vmem>>, vector<8x128xf32>
    tpu.vector_store %arg4[%c0_2, %c0_3], %6 {strides = array<i32>} : memref<8x128xf32, #tpu.memory_space<vmem>>, vector<8x128xf32>,
    return
  }
  func.func @transform_0(%arg0: i32, %arg1: i32) -> (i32, i32) {
    %c0_i32 = arith.constant 0 : i32
    return %arg0, %arg1 : i32, i32
  }
  func.func @transform_1(%arg0: i32, %arg1: i32) -> (i32, i32) {
    %c0_i32 = arith.constant 0 : i32
    %c0_i32_0 = arith.constant 0 : i32
    %c0_i32_1 = arith.constant 0 : i32
    return %c0_i32, %c0_i32_0 : i32, i32
  }
  func.func @transform_2(%arg0: i32, %arg1: i32) -> (i32, i32) {
    %c0_i32 = arith.constant 0 : i32
    %c0_i32_0 = arith.constant 0 : i32
    return %arg0, %c0_i32 : i32, i32
  }
}

</mosaic_0001>

<bundles_post_ra>
// kernel: jl_random_projection.1
= control target key start
LH: loop header
LB: loop body
LE: loop exit
PB: predicated region body
PF: predicated region fallthrough
CT: control target
= control target key end

     0   :  { %s462_s9 = smov 0   ;;  %s464_s10 = smov 0   ;;  %s519_s0 = inlined_call_operand.vmem [shape: f32[16,128], index: 0, kind: input, shape index: {}]   ;;  %s520_s1 = inlined_call_operand.vmem [shape: bf16[128,128], index: 1, kind: input, shape index: {}]   ;;  %s521_s2 = inlined_call_operand.vmem [shape: f32[16,128], index: 2, kind: output, shape index: {}]  }
   0x1   :  { %s466_s11 = smov 0  }
   0x2 LB: > { %s24_s12 = sadd.s32 1, %s439_s10  ;;  %p345_p0 = scmp.ge.s32.totalorder %s443_s11, 1  ;;  %s443_s11 = sphi %s466_s11, %s12_s11   ;;  %s439_s10 = sphi %s464_s10, %s523_s10   ;;  %s435_s9 = sphi %s462_s9, %s522_s9  }
   0x3   : > { %p26_p1 = scmp.ge.s32.totalorder %s24_s12, 2  ;;  %p128_p2 = scmp.lt.s32.totalorder %s443_s11, 3 }
   0x5   : > { %s525_s12 = smov (%p26_p1, %s24_s12), 0  ;;  %p129_p3 = pnand %p345_p0, %p128_p2 }
   0x6   : > { %v413_v0 = vld [vmem:[%s520_s1] sm:$0xff] (!%p129_p3)   ;;  %v445_v1 = vmov (!%p129_p3), 0.0   ;;  %v414_v2 = vld [vmem:[%s520_s1 + $0x8] sm:$0xff] (!%p129_p3)   ;;  %vm446_vm0 = vmmov (!%p129_p3), 0   ;;  %v415_v3 = vld [vmem:[%s520_s1 + $0x10] sm:$0xff] (!%p129_p3)   ;;  %p151_p4 = scmp.lt.s32.totalorder (!%p129_p3), %s435_s9, 1 }
   0x7   : > { %132 = sbr.rel (%p129_p3) target bundleno = 254 (0xfe), region = 28  ;;  %367 = vmatprep.subr.bf16.mxu0 (!%p129_p3), %v445_v1  ;;  %383 = vmatprep.mubr.msk.bf16.mxu0 (!%p129_p3), %vm446_vm0, %v445_v1  ;;  %v416_v4 = vld [vmem:[%s520_s1 + $0x18] sm:$0xff] (!%p129_p3)   ;;  %v417_v5 = vld [vmem:[%s520_s1 + $0x20] sm:$0xff] (!%p129_p3)   ;;  %v418_v6 = vld [vmem:[%s520_s1 + $0x28] sm:$0xff] (!%p129_p3)  }
   0x8   : > { %368 = vmatpush3.bf16.msra.mxu0 (!%p129_p3), %v413_v0  ;;  %v419_v7 = vld [vmem:[%s520_s1 + $0x30] sm:$0xff] (!%p129_p3)   ;;  %v420_v8 = vld [vmem:[%s520_s1 + $0x38] sm:$0xff] (!%p129_p3)  }
   0x9   : > { %369 = vmatprep.subr.bf16.mxu0 (!%p129_p3), %v445_v1 }
   0xc   : > { %370 = vmatpush3.bf16.msra.mxu0 (!%p129_p3), %v414_v2 }
   0xd   : > { %371 = vmatprep.subr.bf16.mxu0 (!%p129_p3), %v445_v1 }
   0xe   : > { %s527_s9 = smov (!%p151_p4, %s435_s9), 1 }
   0xf   : > { %s346_s25 = sshll.u32 %s527_s9, 3 }
  0x10   : > { %372 = vmatpush3.bf16.msra.mxu0 %v415_v3  ;;  %s157_s30 = scalar_lea.vmem %s519_s0, %s346_s25  ;;  %s161_s7 = scalar_lea.vmem %s521_s2, %s346_s25 }
  0x11   : > { %373 = vmatprep.subr.bf16.mxu0 %v445_v1  ;;  %v184_v9 = vld [vmem:[%s157_s30] sm:$0xff] }
  0x12   : > { %v185_v10 = vpack.c.bf16 %v184_v9, %v184_v9 }
  0x14   : > { %374 = vmatpush3.bf16.msra.mxu0 %v416_v4 }
  0x15   : > { %375 = vmatprep.subr.bf16.mxu0 %v445_v1 }
  0x18   : > { %376 = vmatpush3.bf16.msra.mxu0 %v417_v5 }
  0x19   : > { %377 = vmatprep.subr.bf16.mxu0 %v445_v1 }
  0x1c   : > { %378 = vmatpush3.bf16.msra.mxu0 %v418_v6 }
  0x1d   : > { %379 = vmatprep.subr.bf16.mxu0 %v445_v1 }
  0x20   : > { %380 = vmatpush3.bf16.msra.mxu0 %v419_v7 }
  0x21   : > { %381 = vmatprep.subr.bf16.mxu0 %v445_v1 }
  0x24   : > { %382 = vmatpush3.bf16.msra.mxu0 %v420_v8 }
  0x27   : > { %384 = vmatmul.mubr.bf16.vlgmr.msra.gmra.mrb[0].mxu0 %v185_v10 }
  0xfa   : > { %v268_v11 = vpop.f32.mrb[0].mxu0 }
  0xfb   : > { %274 = vst [vmem:[%s161_s7] sm:$0xff] %v268_v11  ;;  %v385_v12 = vpop.f32.mrb[1].mxu0 }
  0xfc   : > { %v271_v13 = vpop.f32.mrb[2].mxu0 }
  0xfd   : > { %v386_v14 = vpop.f32.mrb[3].mxu0 }
  0xfe PF: > { %s12_s11 = sadd.s32 1, %s443_s11   ;;  %s522_s9 = smov %s439_s10 }
  0xff   : > { %p9_p5 = scmp.ge.s32.totalorder %s12_s11, 4   ;;  %s523_s10 = smov %s525_s12 }
 0x101   :  { %11 = sbr.rel (!%p9_p5) target bundleno = 2 (0x2), region = 59 }

</bundles_post_ra>
